<compile_context>
chip_gen: v6e
topology: v6e:2x2x1
jax: 0.10.0
libtpu: 0.0.40
codegen_flags: <defaults>
</compile_context>

<pallas_src>
import functools

import numpy as np

import jax
import jax.numpy as jnp
from jax.experimental import pallas as pl
from jax.experimental.pallas import tpu as pltpu


# ---------------------------------------------------------------------------
# Pallas kernel: one batch tile per grid step.
# ---------------------------------------------------------------------------
def _modelmuti_kernel(xa_ref, wconv_ref, wend_ref, wmlp_ref, bias_ref, out_ref,
                      *, channels, Lp, F, t, ncp, tb_b):
  """xa_ref   : (tb_b*channels, Lp+2) rows=(batch,channel); cols = padded signal
                | per-row BN scale | per-row BN shift.
     wconv_ref: (Lp+2, F) all three conv scales folded into one matmul that also
                performs the permute/reshape/concat (BN cols hit zero rows).
     wend_ref : (F, t)      end_linear weight (transposed).
     wmlp_ref : (t, ncp)    mlp_head weight (transposed, lane-padded).
     bias_ref : (3, W)      packed [conv bias (F) | end bias (t) | mlp bias (ncp)].
     out_ref  : (tb_b, ncp) lane-dense output slab."""
  xa = xa_ref[...]                                        # (tb_rows, Lp+2)
  bias = bias_ref[...]                                    # (3, W)

  # conv1/conv2/conv3 + bias + permute + reshape + concat -> one MXU matmul.
  u = jnp.dot(xa, wconv_ref[...], preferred_element_type=jnp.float32)
  u = u + bias[0:1, :F]                                   # (tb_rows, F)
  u = jnp.maximum(u, 0.0)                                 # relu

  # BatchNorm1d(channels), eval mode, as per-row scale/shift (packed in xa).
  bn_scale = xa[:, Lp:Lp + 1]                             # (tb_rows, 1)
  bn_shift = xa[:, Lp + 1:Lp + 2]
  u = u * bn_scale + bn_shift
  u = jnp.maximum(u, 0.0)                                 # relu on the concat

  # x3 = end_linear(x_conv)
  x3 = jnp.dot(u, wend_ref[...], preferred_element_type=jnp.float32)
  x3 = x3 + bias[1:2, :t]                                 # (tb_rows, t)

  # fl1 = x3.mean(dim=1) -- mean over the channel rows of each batch element.
  if channels == 1:
    fl1 = x3                                              # (tb_b, t)
  else:
    fl1 = jnp.mean(x3.reshape(tb_b, channels, t), axis=1)

  # fl = mlp_head(fl1); lane-dense (num_class padded to ncp) store.
  fl = jnp.dot(fl1, wmlp_ref[...], preferred_element_type=jnp.float32)
  out_ref[...] = fl + bias[2:3, :ncp]


# ---------------------------------------------------------------------------
# Wrapper
# ---------------------------------------------------------------------------
def modelmuti_forward(x, x_graph, params, *, channels, cs, L, ks, t,
                      num_class, bn_eps=1e-5, max_batch_tile=512):
  del x_graph  # decoder output is overwritten by end_linear in the reference
  assert all(k % 2 == 1 for k in ks), "padding=k//2 preserves length only for odd k"
  B = int(x.shape[0])

  # ----- batch tiling: whole batch per step when small, 512-elem tiles else --
  if B <= max_batch_tile:
    tb_b, Bp = B, B
  else:
    tb_b = max_batch_tile                       # multiple of 8 -> legal sub-block
    Bp = ((B + tb_b - 1) // tb_b) * tb_b
  grid = (Bp // tb_b,)
  tb_rows = tb_b * channels

  max_pad = max(ks) // 2
  Lp = L + 2 * max_pad
  Lpa = Lp + 2                                  # + BN scale/shift columns
  F = 3 * cs * L                                # multi-scale concat width (= a)
  ncp = ((max(num_class, 1) + 127) // 128) * 128
  W = max(F, ncp, t)

  # ----- host-side constant folding (once per parameter set) -----------------
  # Conv2d(1, cs, (1,k)) on each channel row == dense (Lpa, F) matrix acting on
  # the max-padded signal; column order matches the PyTorch
  # permute(0,2,1,3).reshape concat: scale-major, conv-channel, then position.
  wbig = np.zeros((Lpa, F), np.float32)
  bias_conv = np.zeros((F,), np.float32)
  for s, k in enumerate(ks):
    off = max_pad - k // 2
    w = np.asarray(params[f"conv{s}_w"], np.float32).reshape(cs, k)
    b = np.asarray(params[f"conv{s}_b"], np.float32).reshape(cs)
    for o in range(cs):
      base = s * cs * L + o * L
      for l in range(L):
        wbig[off + l:off + l + k, base + l] = w[o]
        bias_conv[base + l] = b[o]
  wconv = jnp.asarray(wbig)                                              # (Lpa, F)

  wend = jnp.asarray(params["Wend"], jnp.float32).reshape(t, F).T        # (F, t)
  wmlp = jnp.asarray(params["Wmlp"], jnp.float32).reshape(num_class, t).T
  wmlp = jnp.pad(wmlp, ((0, 0), (0, ncp - num_class)))                   # (t, ncp)

  bias_pack = jnp.stack([
      jnp.pad(jnp.asarray(bias_conv), (0, W - F)),
      jnp.pad(params["bend"].reshape(t).astype(jnp.float32), (0, W - t)),
      jnp.pad(params["bmlp"].reshape(num_class).astype(jnp.float32),
              (0, W - num_class)),
  ], axis=0)                                                             # (3, W)

  # BatchNorm1d(channels) eval-mode scale/shift, one value per (batch, channel) row.
  g = params["bn_g"].reshape(channels).astype(jnp.float32)
  be = params["bn_b"].reshape(channels).astype(jnp.float32)
  m = params["bn_m"].reshape(channels).astype(jnp.float32)
  v = params["bn_v"].reshape(channels).astype(jnp.float32)
  scale_c = g * jax.lax.rsqrt(v + bn_eps)
  shift_c = be - m * scale_c
  rows_scale = jnp.tile(scale_c, Bp)                                     # (Bp*C,)
  rows_shift = jnp.tile(shift_c, Bp)

  # x padded ONCE to the largest kernel, augmented with the BN columns.
  x2 = x.reshape(B, channels, L).astype(jnp.float32)
  xp = jnp.pad(x2, ((0, Bp - B), (0, 0), (max_pad, max_pad)))
  xrows = xp.reshape(Bp * channels, Lp)
  xa = jnp.concatenate([xrows, rows_scale[:, None], rows_shift[:, None]], axis=1)

  kernel = functools.partial(_modelmuti_kernel, channels=channels, Lp=Lp, F=F,
                             t=t, ncp=ncp, tb_b=tb_b)

  flops = int(2 * Bp * channels * Lpa * F + 2 * Bp * channels * F * t
              + 2 * Bp * t * ncp)
  bytes_accessed = int(4 * (xa.size + Bp * ncp
                            + grid[0] * (wconv.size + wend.size + wmlp.size
                                         + bias_pack.size)))

  out = pl.pallas_call(
      kernel,
      out_shape=jax.ShapeDtypeStruct((Bp, ncp), jnp.float32),
      grid_spec=pltpu.PrefetchScalarGridSpec(
          num_scalar_prefetch=0,
          grid=grid,
          in_specs=[
              pl.BlockSpec((tb_rows, Lpa), lambda i: (i, 0)),   # x slab (blocked)
              pl.BlockSpec((Lpa, F), lambda i: (0, 0)),         # folded conv weight
              pl.BlockSpec((F, t), lambda i: (0, 0)),           # end_linear weight
              pl.BlockSpec((t, ncp), lambda i: (0, 0)),         # mlp_head weight
              pl.BlockSpec((3, W), lambda i: (0, 0)),           # packed biases
          ],
          out_specs=pl.BlockSpec((tb_b, ncp), lambda i: (i, 0)),
      ),
      compiler_params=pltpu.CompilerParams(
          dimension_semantics=("parallel",)),
      cost_estimate=pl.CostEstimate(
          flops=flops, transcendentals=0, bytes_accessed=bytes_accessed),
  )(xa, wconv, wend, wmlp, bias_pack)

  # TODO(synk): mid_linear / graph decoder are computed in the PyTorch forward
  # but feed nothing that reaches the return value; they are omitted here.
  return out[:B, :num_class]


# ---------------------------------------------------------------------------
# Pure-JAX reference (sanity check against the kernel).
# ---------------------------------------------------------------------------
def reference_forward(x, x_graph, params, *, channels, cs, L, ks, t,
                      num_class, bn_eps=1e-5):
  del x_graph
  B = x.shape[0]
  x2 = x.reshape(B, channels, L).astype(jnp.float32)
  c = x2[:, None, :, :]                                    # NCHW (B,1,channels,L)
  bn_g = params["bn_g"].reshape(channels)
  bn_b = params["bn_b"].reshape(channels)
  bn_m = params["bn_m"].reshape(channels)
  bn_v = params["bn_v"].reshape(channels)
  feats = []
  for i, k in enumerate(ks):
    w = params[f"conv{i}_w"].reshape(cs, 1, 1, k)
    b = params[f"conv{i}_b"].reshape(cs)
    y = jax.lax.conv_general_dilated(
        c, w, window_strides=(1, 1), padding=((0, 0), (k // 2, k // 2)),
        dimension_numbers=("NCHW", "OIHW", "NCHW"))
    y = y + b[None, :, None, None]                         # (B, cs, channels, L)
    y = jnp.transpose(y, (0, 2, 1, 3)).reshape(B, channels, cs * L)
    y = jnp.maximum(y, 0.0)
    scale = bn_g / jnp.sqrt(bn_v + bn_eps)
    y = (y - bn_m[None, :, None]) * scale[None, :, None] + bn_b[None, :, None]
    feats.append(y)
  xcat = jnp.maximum(jnp.concatenate(feats, axis=2), 0.0)  # (B, channels, 3*cs*L)
  x3 = xcat @ params["Wend"].T + params["bend"].reshape(t)
  fl1 = x3.mean(axis=1)
  fl = fl1 @ params["Wmlp"].T + params["bmlp"].reshape(num_class)
  return fl


# ---------------------------------------------------------------------------
# Main
# ---------------------------------------------------------------------------
if __name__ == "__main__":
  # Shape-consistent configuration:
  #   channels=1, channel_size(cs)=4, L=12, k_sizes=(3,5,7), t=4
  #   => a = 3*cs*L = 144 = t*12*3
  B, channels, L = 4, 1, 12
  cs = 4
  ks = (3, 5, 7)
  t = 4
  num_class = 3
  n_e = 5

  key = jax.random.PRNGKey(0)
  keys = jax.random.split(key, 20)
  a_dim = 3 * cs * L

  params = {
      "conv0_w": 0.2 * jax.random.normal(keys[0], (cs, ks[0]), jnp.float32),
      "conv0_b": 0.1 * jax.random.normal(keys[1], (1, cs), jnp.float32),
      "conv1_w": 0.2 * jax.random.normal(keys[2], (cs, ks[1]), jnp.float32),
      "conv1_b": 0.1 * jax.random.normal(keys[3], (1, cs), jnp.float32),
      "conv2_w": 0.2 * jax.random.normal(keys[4], (cs, ks[2]), jnp.float32),
      "conv2_b": 0.1 * jax.random.normal(keys[5], (1, cs), jnp.float32),
      "bn_g": 1.0 + 0.1 * jax.random.normal(keys[12], (1, channels), jnp.float32),
      "bn_b": 0.1 * jax.random.normal(keys[13], (1, channels), jnp.float32),
      "bn_m": 0.1 * jax.random.normal(keys[14], (1, channels), jnp.float32),
      "bn_v": 1.0 + 0.2 * jax.random.uniform(keys[15], (1, channels), jnp.float32),
      "Wend": 0.1 * jax.random.normal(keys[6], (t, a_dim), jnp.float32),
      "bend": 0.05 * jax.random.normal(keys[7], (1, t), jnp.float32),
      "Wmlp": 0.3 * jax.random.normal(keys[8], (num_class, t), jnp.float32),
      "bmlp": 0.05 * jax.random.normal(keys[9], (1, num_class), jnp.float32),
  }

  x = jax.random.normal(keys[10], (B, channels, L), jnp.float32)
  x_graph = jax.random.uniform(keys[11], (B, n_e, n_e), jnp.float32)

  out = modelmuti_forward(x, x_graph, params, channels=channels, cs=cs, L=L,
                          ks=ks, t=t, num_class=num_class)
  out = jax.block_until_ready(out)

  ref = reference_forward(x, x_graph, params, channels=channels, cs=cs, L=L,
                          ks=ks, t=t, num_class=num_class)
  ref = jax.block_until_ready(ref)

  assert out.shape == (B, num_class)
  assert jnp.allclose(out, ref, atol=1e-3, rtol=1e-3), (out, ref)
  print("KERNEL_OK")
</pallas_src>

<mosaic_0001>
module attributes {stable_mosaic.version = 11 : i64} {
  func.func @_modelmuti_kernel(%arg0: i32, %arg1: memref<4x20xf32, #tpu.memory_space<vmem>>, %arg2: memref<20x144xf32, #tpu.memory_space<vmem>>, %arg3: memref<144x4xf32, #tpu.memory_space<vmem>>, %arg4: memref<4x128xf32, #tpu.memory_space<vmem>>, %arg5: memref<3x144xf32, #tpu.memory_space<vmem>>, %arg6: memref<4x128xf32, #tpu.memory_space<vmem>>) attributes {dimension_semantics = [#tpu.dimension_semantics<parallel>], iteration_bounds = array<i64: 1>, scalar_prefetch = 0 : i64, scratch_operands = 0 : i64, tpu.core_type = #tpu.core_type<tc>, window_params = [{transform_indices = @transform_0, window_bounds = array<i64: 4, 20>}, {pipeline_mode = #tpu.pipeline_mode<synchronous>, transform_indices = @transform_1, window_bounds = array<i64: 20, 144>}, {pipeline_mode = #tpu.pipeline_mode<synchronous>, transform_indices = @transform_2, window_bounds = array<i64: 144, 4>}, {pipeline_mode = #tpu.pipeline_mode<synchronous>, transform_indices = @transform_3, window_bounds = array<i64: 4, 128>}, {pipeline_mode = #tpu.pipeline_mode<synchronous>, transform_indices = @transform_4, window_bounds = array<i64: 3, 144>}, {transform_indices = @transform_5, window_bounds = array<i64: 4, 128>}]} {
    %c0 = arith.constant 0 : index
    %c0_0 = arith.constant 0 : index
    %0 = vector.load %arg1[%c0, %c0_0] : memref<4x20xf32, #tpu.memory_space<vmem>>, vector<4x20xf32>
    %c0_1 = arith.constant 0 : index
    %c0_2 = arith.constant 0 : index
    %1 = vector.load %arg5[%c0_1, %c0_2] : memref<3x144xf32, #tpu.memory_space<vmem>>, vector<3x144xf32>
    %c0_3 = arith.constant 0 : index
    %c0_4 = arith.constant 0 : index
    %2 = vector.load %arg2[%c0_3, %c0_4] : memref<20x144xf32, #tpu.memory_space<vmem>>, vector<20x144xf32>
    %cst = arith.constant dense<0.000000e+00> : vector<4x144xf32>
    %3 = tpu.matmul %0, %2, %cst {dimension_numbers = #tpu.dot_dimension_numbers<[1], [0], [0], [1], [0, 0, 1, 1], [], []>} : vector<4x20xf32>, vector<20x144xf32>, vector<4x144xf32> -> vector<4x144xf32>
    %4 = vector.extract_strided_slice %1 {offsets = [0, 0], sizes = [1, 144], strides = [1, 1]} : vector<3x144xf32> to vector<1x144xf32>
    %5 = vector.broadcast %4 : vector<1x144xf32> to vector<4x144xf32>
    %6 = arith.addf %3, %5 : vector<4x144xf32>
    %cst_5 = arith.constant 0.000000e+00 : f32
    %7 = vector.broadcast %cst_5 : f32 to vector<4x144xf32>
    %8 = arith.maximumf %6, %7 : vector<4x144xf32>
    %9 = vector.extract_strided_slice %0 {offsets = [0, 18], sizes = [4, 1], strides = [1, 1]} : vector<4x20xf32> to vector<4x1xf32>
    %10 = vector.extract_strided_slice %0 {offsets = [0, 19], sizes = [4, 1], strides = [1, 1]} : vector<4x20xf32> to vector<4x1xf32>
    %11 = vector.broadcast %9 : vector<4x1xf32> to vector<4x144xf32>
    %12 = arith.mulf %8, %11 : vector<4x144xf32>
    %13 = vector.broadcast %10 : vector<4x1xf32> to vector<4x144xf32>
    %14 = arith.addf %12, %13 : vector<4x144xf32>
    %cst_6 = arith.constant 0.000000e+00 : f32
    %15 = vector.broadcast %cst_6 : f32 to vector<4x144xf32>
    %16 = arith.maximumf %14, %15 : vector<4x144xf32>
    %c0_7 = arith.constant 0 : index
    %c0_8 = arith.constant 0 : index
    %17 = vector.load %arg3[%c0_7, %c0_8] : memref<144x4xf32, #tpu.memory_space<vmem>>, vector<144x4xf32>
    %cst_9 = arith.constant dense<0.000000e+00> : vector<4x4xf32>
    %18 = tpu.matmul %16, %17, %cst_9 {dimension_numbers = #tpu.dot_dimension_numbers<[1], [0], [0], [1], [0, 0, 1, 1], [], []>} : vector<4x144xf32>, vector<144x4xf32>, vector<4x4xf32> -> vector<4x4xf32>
    %19 = vector.extract_strided_slice %1 {offsets = [1, 0], sizes = [1, 4], strides = [1, 1]} : vector<3x144xf32> to vector<1x4xf32>
    %20 = vector.broadcast %19 : vector<1x4xf32> to vector<4x4xf32>
    %21 = arith.addf %18, %20 : vector<4x4xf32>
    %c0_10 = arith.constant 0 : index
    %c0_11 = arith.constant 0 : index
    %22 = vector.load %arg4[%c0_10, %c0_11] : memref<4x128xf32, #tpu.memory_space<vmem>>, vector<4x128xf32>
    %cst_12 = arith.constant dense<0.000000e+00> : vector<4x128xf32>
    %23 = tpu.matmul %21, %22, %cst_12 {dimension_numbers = #tpu.dot_dimension_numbers<[1], [0], [0], [1], [0, 0, 1, 1], [], []>} : vector<4x4xf32>, vector<4x128xf32>, vector<4x128xf32> -> vector<4x128xf32>
    %24 = vector.extract_strided_slice %1 {offsets = [2, 0], sizes = [1, 128], strides = [1, 1]} : vector<3x144xf32> to vector<1x128xf32>
    %25 = vector.broadcast %24 : vector<1x128xf32> to vector<4x128xf32>
    %26 = arith.addf %23, %25 : vector<4x128xf32>
    %c0_13 = arith.constant 0 : index
    %c0_14 = arith.constant 0 : index
    %27 = vector.load %arg6[%c0_13, %c0_14] : memref<4x128xf32, #tpu.memory_space<vmem>>, vector<4x128xf32>
    tpu.vector_store %arg6[%c0_13, %c0_14], %26 {strides = array<i32>} : memref<4x128xf32, #tpu.memory_space<vmem>>, vector<4x128xf32>,
    return
  }
  func.func @transform_0(%arg0: i32) -> (i32, i32) {
    %c0_i32 = arith.constant 0 : i32
    %c0_i32_0 = arith.constant 0 : i32
    return %arg0, %c0_i32 : i32, i32
  }
  func.func @transform_1(%arg0: i32) -> (i32, i32) {
    %c0_i32 = arith.constant 0 : i32
    %c0_i32_0 = arith.constant 0 : i32
    %c0_i32_1 = arith.constant 0 : i32
    return %c0_i32, %c0_i32_0 : i32, i32
  }
  func.func @transform_2(%arg0: i32) -> (i32, i32) {
    %c0_i32 = arith.constant 0 : i32
    %c0_i32_0 = arith.constant 0 : i32
    %c0_i32_1 = arith.constant 0 : i32
    return %c0_i32, %c0_i32_0 : i32, i32
  }
  func.func @transform_3(%arg0: i32) -> (i32, i32) {
    %c0_i32 = arith.constant 0 : i32
    %c0_i32_0 = arith.constant 0 : i32
    %c0_i32_1 = arith.constant 0 : i32
    return %c0_i32, %c0_i32_0 : i32, i32
  }
  func.func @transform_4(%arg0: i32) -> (i32, i32) {
    %c0_i32 = arith.constant 0 : i32
    %c0_i32_0 = arith.constant 0 : i32
    %c0_i32_1 = arith.constant 0 : i32
    return %c0_i32, %c0_i32_0 : i32, i32
  }
  func.func @transform_5(%arg0: i32) -> (i32, i32) {
    %c0_i32 = arith.constant 0 : i32
    %c0_i32_0 = arith.constant 0 : i32
    return %arg0, %c0_i32 : i32, i32
  }
}

</mosaic_0001>

<bundles_post_ra>
// kernel: tpu_custom_call.1
= control target key start
LH: loop header
LB: loop body
LE: loop exit
PB: predicated region body
PF: predicated region fallthrough
CT: control target
= control target key end

     0   :  { %vm52_vm0 = vcmask 1043456   ;;  %v381_v5 = vmov 0.0   ;;  %v382_v8 = vmov 18   ;;  %vm48_vm1 = vcmask 162816   ;;  %s524_s0 = inlined_call_operand.vmem [shape: f32[4,20], index: 0, kind: input, shape index: {}]   ;;  %s525_s1 = inlined_call_operand.vmem [shape: f32[20,144], index: 1, kind: input, shape index: {}]   ;;  %s526_s2 = inlined_call_operand.vmem [shape: f32[144,4], index: 2, kind: input, shape index: {}]   ;;  %s527_s3 = inlined_call_operand.vmem [shape: f32[4,128], index: 3, kind: input, shape index: {}]   ;;  %s528_s4 = inlined_call_operand.vmem [shape: f32[3,144], index: 4, kind: input, shape index: {}]   ;;  %s529_s5 = inlined_call_operand.hbm [shape: f32[4,128], index: 5, kind: output, shape index: {}]  }
   0x1   :  { %v28_v0 = vld [vmem:[%s525_s1 + $0x28] sm:$0xf]  ;;  %v27_v1 = vld [vmem:[%s525_s1 + $0x20] sm:$0xf]  ;;  %v26_v2 = vld [vmem:[%s525_s1 + $0x18] sm:$0xff]  ;;  %123 = vmatprep.mubr.f32.mxu0 %v381_v5  ;;  %357 = vset.pattern.permute.xlu0 %v382_v8 }
   0x2   :  { %339 = vmatprep.subr.msk.mxu0 %vm52_vm0, %v28_v0  ;;  %v25_v3 = vld [vmem:[%s525_s1 + $0x10] sm:$0xff]  ;;  %v24_v4 = vld [vmem:[%s525_s1 + $0x8] sm:$0xff]  ;;  %v23_v6 = vld [vmem:[%s525_s1] sm:$0xff]  ;;  %172 = vmatprep.subr.mxu1 %v381_v5 }
   0x3   :  { %340 = vmatpush1.msk.msra.mxu0 %vm52_vm0, %v27_v1  ;;  %v21_v7 = vld [vmem:[%s524_s0] sm:$0xf]  ;;  %v161_v9 = vld [vmem:[%s526_s2 + $0x78] sm:$0xff]  ;;  %v160_v10 = vld [vmem:[%s526_s2 + $0x70] sm:$0xff] }
   0x4   :  { %87 = vmatprep.subr.mxu0 %v26_v2  ;;  %133 = vperm.xlu0 %357, %v21_v7  }
   0x5   :  { %88 = vmatpush1.msra.mxu0 %v25_v3  ;;  %173 = vmatpush1.msra.mxu1 %v161_v9 }
   0x6   :  { %89 = vmatprep.subr.mxu0 %v24_v4 }
   0x7   :  { %90 = vmatpush1.msra.mxu0 %v23_v6 }
   0x8   :  { %10 = vsyncpa [#allocation3], 0  ;;  %341 = vmatmul.mubr.msk.f32.vlgmr.msra.gmra.mxu0 %vm48_vm1, %v21_v7  ;;  %174 = vmatprep.subr.mxu1 %v381_v5  ;;  %v159_v11 = vld [vmem:[%s526_s2 + $0x68] sm:$0xff]  ;;  %v383_v12 = vmov 19   ;;  %v158_v13 = vld [vmem:[%s526_s2 + $0x60] sm:$0xff]  ;;  %v30_v29 = vlaneseq  ;;  %vm168_vm2 = vcmask 130048  }
   0x9   :  { %358 = vset.pattern.permute.xlu0 %v383_v12  ;;  %175 = vmatpush1.msra.mxu1 %v160_v10  ;;  %v157_v14 = vld [vmem:[%s526_s2 + $0x58] sm:$0xff]  ;;  %v156_v15 = vld [vmem:[%s526_s2 + $0x50] sm:$0xff]  ;;  %v155_v16 = vld [vmem:[%s526_s2 + $0x48] sm:$0xff]  ;;  %vm384_vm3 = vmmov 0   ;;  %vm247_vm4 = vcmask 31744  }
   0xa   :  { %139 = vperm.xlu0 %358, %v21_v7   ;;  %176 = vmatprep.subr.mxu1 %v381_v5  ;;  %v154_v17 = vld [vmem:[%s526_s2 + $0x40] sm:$0xff]  ;;  %v153_v18 = vld [vmem:[%s526_s2 + $0x38] sm:$0xff]  ;;  %v152_v19 = vld [vmem:[%s526_s2 + $0x30] sm:$0xff]  ;;  %v31_v30 = vshrl.u32 %v30_v29, 7 }
   0xb   :  { %177 = vmatpush1.msra.mxu1 %v159_v11  ;;  %347 = vmatprep.subr.mxu0 %v381_v5  ;;  %v151_v20 = vld [vmem:[%s526_s2 + $0x28] sm:$0xff]  ;;  %v150_v21 = vld [vmem:[%s526_s2 + $0x20] sm:$0xff]  ;;  %v149_v22 = vld [vmem:[%s526_s2 + $0x18] sm:$0xff] }
   0xc   :  { %178 = vmatprep.subr.mxu1 %v381_v5  ;;  %v148_v23 = vld [vmem:[%s526_s2 + $0x10] sm:$0xff]  ;;  %v147_v24 = vld [vmem:[%s526_s2 + $0x8] sm:$0xff]  ;;  %v146_v25 = vld [vmem:[%s526_s2] sm:$0xff]  ;;  %v32_v31 = vsub.s32 0, %v31_v30  ;;  %v36_v33 = vsub.s32 4, %v31_v30  ;;  %349 = vmatprep.mubr.msk.f32.mxu0 %vm384_vm3, %v381_v5  ;;  %v166_v52 = vsub.s32 1, %v31_v30 }
   0xd   :  { %179 = vmatpush1.msra.mxu1 %v158_v13  ;;  %v163_v26 = vld [vmem:[%s526_s2 + $0x88] sm:$0xff]  ;;  %v162_v27 = vld [vmem:[%s526_s2 + $0x80] sm:$0xff]  ;;  %v245_v57 = vsub.s32 2, %v31_v30  ;;  %s385_s2 = smov [#allocation2]  }
   0xe   :  { %180 = vmatprep.subr.mxu1 %v381_v5  ;;  %v242_v28 = vld [vmem:[%s527_s3] sm:$0xf]  ;;  %s331_s3 = sshll.u32 %s385_s2, 4  ;;  %s332_s3 = int_to_ptr.vmem [resolvable:$true] %s331_s3 }
   0xf   :  { %181 = vmatpush1.msra.mxu1 %v157_v14  ;;  %348 = vmatpush3.msk.msra.mxu0 %vm52_vm0, %v242_v28  ;;  %v22_v32 = vld [vmem:[%s528_s4] sm:$0x77]  ;;  %s359_s4 = scalar_lea.vmem %s332_s3, 64  ;;  %p364_p1 = scmp.lt.s32.totalorder %s332_s3, %s332_s3 }
  0x10   :  { %182 = vmatprep.subr.mxu1 %v381_v5  ;;  %v33_v34 = vrot.slane %v22_v32, %v32_v31  ;;  %v37_v35 = vrot.slane %v22_v32, %v36_v33  ;;  %v167_v53 = vrot.slane %v22_v32, %v166_v52  ;;  %v246_v58 = vrot.slane %v22_v32, %v245_v57  ;;  %p360_p0 = scmp.ne.s32.totalorder %s332_s3, %s359_s4  ;;  %p365_p2 = scmp.lt.s32.totalorder %s359_s4, %s359_s4 }
  0x11   :  { %183 = vmatpush1.msra.mxu1 %v156_v15 }
  0x12   :  { %184 = vmatprep.subr.mxu1 %v381_v5  ;;  %v43_v36 = vrot.slane %v33_v34, %v32_v31  ;;  %v47_v38 = vrot.slane %v37_v35, %v32_v31  ;;  %p366_p3 = por %p365_p2, %p364_p1 }
  0x13   :  { %185 = vmatpush1.msra.mxu1 %v155_v16 }
  0x14   :  { %186 = vmatprep.subr.mxu1 %v381_v5  ;;  %p367_p4 = pnand %p366_p3, %p360_p0 }
  0x15   :  { %187 = vmatpush1.msra.mxu1 %v154_v17 }
  0x16   :  { %188 = vmatprep.subr.mxu1 %v381_v5 }
  0x17   :  { %189 = vmatpush1.msra.mxu1 %v153_v18 }
  0x18   :  { %190 = vmatprep.subr.mxu1 %v381_v5 }
  0x19   :  { %191 = vmatpush1.msra.mxu1 %v152_v19 }
  0x1a   :  { %192 = vmatprep.subr.mxu1 %v381_v5 }
  0x1b   :  { %193 = vmatpush1.msra.mxu1 %v151_v20 }
  0x1c   :  { %194 = vmatprep.subr.mxu1 %v381_v5 }
  0x1d   :  { %195 = vmatpush1.msra.mxu1 %v150_v21 }
  0x1e   :  { %196 = vmatprep.subr.mxu1 %v381_v5 }
  0x1f   :  { %197 = vmatpush1.msra.mxu1 %v149_v22 }
  0x20   :  { %198 = vmatprep.subr.mxu1 %v381_v5 }
  0x21   :  { %199 = vmatpush1.msra.mxu1 %v148_v23 }
  0x22   :  { %200 = vmatprep.subr.mxu1 %v381_v5 }
  0x23   :  { %201 = vmatpush1.msra.mxu1 %v147_v24 }
  0x24   :  { %202 = vmatprep.subr.mxu1 %v381_v5 }
  0x25   :  { %203 = vmatpush1.msra.mxu1 %v146_v25 }
  0x26   :  { %232 = vmatprep.subr.mxu1 %v381_v5 }
  0x27   :  { %233 = vmatpush2.msra.mxu1 %v163_v26 }
  0x28   :  { %234 = vmatprep.subr.mxu1 %v381_v5 }
  0x29   :  { %235 = vmatpush2.msra.mxu1 %v162_v27 }
  0x7f   :  { %v134_v37 = vpop.permute.xlu0 %133 }
  0x85   :  { %v140_v46 = vpop.permute.xlu0 %139 }
  0xc8   :  { %v125_v39 = vpop.f32.mrf.mxu0 }
  0xc9   :  { %v126_v40 = vadd.f32 %v125_v39, %v43_v36 }
  0xca   :  { %v127_v41 = vpop.f32.mrf.mxu0 }
  0xcb   :  { %v130_v42 = vmax.f32 %v126_v40, 0.0  ;;  %v128_v43 = vadd.f32 %v127_v41, %v47_v38 }
  0xcd   :  { %v136_v44 = vmul.f32 %v134_v37, %v130_v42  ;;  %v131_v45 = vmax.f32 %v128_v43, 0.0 }
  0xcf   :  { %v137_v47 = vmul.f32 %v134_v37, %v131_v45  ;;  %v142_v48 = vadd.f32 %v140_v46, %v136_v44 }
  0xd1   :  { %v143_v49 = vadd.f32 %v140_v46, %v137_v47  ;;  %v144_v51 = vmax.f32 %v142_v48, 0.0 }
  0xd3   :  { %v145_v50 = vmax.f32 %v143_v49, 0.0 }
  0xd5   :  { %342 = vmatprep.mubr.msk.f32.mxu1 %vm168_vm2, %v145_v50 }
  0xd6   :  { %237 = vmatmul.mubr.f32.vlgmr.msra.gmra.mxu1 %v144_v51 }
 0x196   :  { %v238_v54 = vpop.f32.mrf.mxu1 }
 0x197   :  { %v239_v55 = vadd.f32 %v238_v54, %v167_v53 }
 0x198   :  { %v240_v56 = vpop.f32.mrf.mxu1 }
 0x199   :  { %350 = vmatmul.mubr.msk.f32.vlgmr.msra.gmra.mxu0 %vm247_vm4, %v239_v55 }
 0x259   :  { %v320_v59 = vpop.f32.mrf.mxu0 }
 0x25a   :  { %v321_v60 = vadd.f32 %v320_v59, %v246_v58 }
 0x25b   :  { %v351_v61 = vpop.f32.mrf.mxu0 }
 0x25c   :  { %324 = vst [vmem:[#allocation2] sm:$0xf] %v321_v60 }
 0x25d   :  { %370 = shalt.err (!%p367_p4)
}
 0x25e   :  { %334 = dma.vmem_to_hbm [thread:$0]  %s332_s3, 64, %s529_s5, [#allocation3]  }
 0x25f   :  { %379 = dma.done.wait [#allocation3], 64  }
 0x260   :  { %380 = vsyncadd [#allocation3], 4294967232 }
 0x261   :  { %338 = vsyncpa [#allocation3], 1 }

</bundles_post_ra>
